<compile_context>
chip_gen: v7x
topology: tpu7x:2x2x1
jax: 0.10.0
libtpu: 0.0.40
codegen_flags: <defaults>
</compile_context>

<pallas_src>
import functools

import jax
import jax.numpy as jnp
from jax.experimental import pallas as pl
from jax.experimental.pallas import tpu as pltpu


def atten_kernel(x_ref, w_ref, b_ref, o_ref, *, tb, seq, seq_valid, dim):
    # x_ref: (tb*seq, dim)   tb batch elements, flattened over the (padded) seq axis
    # w_ref: (dim, dim_p)    fused weight: cols [0,dim)=fc2.weight.T, col dim=fc1.weight
    # b_ref: (1, dim_p)      fused bias:   cols [0,dim)=fc2.bias, rest 0 (fc1 bias dropped)
    # o_ref: (tb, dim_p)     lane-dense padded output (junk cols >= dim sliced off outside)
    xw = jnp.dot(x_ref[...], w_ref[...], preferred_element_type=jnp.float32)
    xw = xw + b_ref[...]                             # (tb*seq, dim_p)
    dim_p = xw.shape[-1]

    # seq is padded to a multiple of 8 wrapper-side -> sublane-only split, no relayout.
    xw3 = xw.reshape(tb, seq, dim_p)                 # (tb, seq, dim_p)

    # fc1 logits live in the extra column `dim`; softmax over the sequence axis.
    logits = xw3[:, :, dim:dim + 1]                  # (tb, seq, 1)
    if seq_valid < seq:                              # mask zero-padded sequence rows
        pos = jax.lax.broadcasted_iota(jnp.int32, (tb, seq, 1), 1)
        logits = jnp.where(pos < seq_valid, logits, -jnp.inf)
    m = jnp.max(logits, axis=1, keepdims=True)
    e = jnp.exp(logits - m)
    attn = e / jnp.sum(e, axis=1, keepdims=True)     # (tb, seq, 1)

    # fc2 + relu.  Padded columns (>= dim) carry junk but are discarded in the wrapper.
    h = jnp.maximum(xw3, 0.0)                        # (tb, seq, dim_p)

    # bmm((1,L),(L,D)) per element == broadcast multiply (VPU) + sublane reduce (XLU).
    out = jnp.sum(attn * h, axis=1)                  # (tb, dim_p)

    # Lane-dense full-width store (no masked partial stores).
    o_ref[...] = out.astype(o_ref.dtype)


def atten_forward(x, w1, b1, w2, b2, *, tb=None):
    """x: (B, L, D) f32.  w1: (1, D), b1: (1,), w2: (D, D), b2: (D,)  (PyTorch layout)."""
    B, L, D = x.shape
    del b1  # softmax(logits + c) == softmax(logits): fc1 bias is a mathematical no-op.

    # Fused weight / bias, output dim padded to a lane multiple (128).
    dim_p = ((D + 1 + 127) // 128) * 128
    w_aug = jnp.zeros((D, dim_p), x.dtype)
    w_aug = w_aug.at[:, :D].set(w2.T)               # fc2  [in, out]
    w_aug = w_aug.at[:, D].set(w1[0])               # fc1 as one extra output column
    b_aug = jnp.zeros((1, dim_p), x.dtype).at[0, :D].set(b2)

    # Pad the sequence axis to a sublane multiple so the in-kernel reshape is free.
    L_pad = ((L + 7) // 8) * 8
    if L_pad != L:
        x = jnp.pad(x, ((0, 0), (0, L_pad - L), (0, 0)))

    # --- Batch tile selection ------------------------------------------------
    # Target M = tb*L_pad ~= 1024 rows per grid step (DMA roofline + amortize the
    # ~0.35us per-step overhead + fill the MXU M dim), capped so one lane-padded
    # x buffer stays ~<= 4 MiB (fits v7x's 64 MiB VMEM / 32 MiB scoped default
    # with double-buffering and plenty of headroom).
    x_lanes = max(128, ((D + 127) // 128) * 128)
    if tb is None:
        tb = max(1, 1024 // L_pad)
        tb = min(tb, max(1, (4 << 20) // (L_pad * x_lanes * 4)))
    tb = max(1, min(tb, B))
    if B >= 2:
        tb = min(tb, (B + 1) // 2)   # >= 2 grid steps: keeps both v7x TensorCores busy
    if tb >= 8:
        tb = (tb // 8) * 8           # sublane-aligned block shapes
    else:
        tb = B                       # tiny batch: single full-extent block
    n_blocks = pl.cdiv(B, tb)
    b_pad = n_blocks * tb
    if b_pad != B:
        x = jnp.pad(x, ((0, b_pad - B), (0, 0), (0, 0)))
    x2d = x.reshape(b_pad * L_pad, D)                # wrapper-side reshape, no in-kernel gather

    kernel = functools.partial(atten_kernel, tb=tb, seq=L_pad, seq_valid=L, dim=D)

    itemsize = jnp.dtype(x.dtype).itemsize
    cost = pl.CostEstimate(
        flops=int(2 * b_pad * L_pad * D * dim_p + 6 * b_pad * L_pad * dim_p),
        transcendentals=int(b_pad * L_pad),
        bytes_accessed=int((b_pad * L_pad * D + b_pad * dim_p + D * dim_p + dim_p) * itemsize),
    )

    out = pl.pallas_call(
        kernel,
        out_shape=jax.ShapeDtypeStruct((b_pad, dim_p), x.dtype),
        grid_spec=pltpu.PrefetchScalarGridSpec(
            num_scalar_prefetch=0,
            grid=(n_blocks,),
            in_specs=[
                pl.BlockSpec((tb * L_pad, D), lambda b: (b, 0)),   # streamed activations
                pl.BlockSpec((D, dim_p), lambda b: (0, 0)),        # resident fused weight
                pl.BlockSpec((1, dim_p), lambda b: (0, 0)),        # resident fused bias
            ],
            out_specs=pl.BlockSpec((tb, dim_p), lambda b: (b, 0)), # lane-dense padded output
        ),
        compiler_params=pltpu.CompilerParams(
            dimension_semantics=("parallel",)),
        cost_estimate=cost,
    )(x2d, w_aug, b_aug)
    return out[:B, :D]


def atten_reference(x, w1, b1, w2, b2):
    logits = jnp.einsum("bld,od->blo", x, w1, precision="highest") + b1    # (B, L, 1)
    attn = jax.nn.softmax(logits, axis=1)                                  # (B, L, 1)
    h = jax.nn.relu(jnp.einsum("bld,od->blo", x, w2, precision="highest") + b2)
    return jnp.einsum("blo,bld->bd", attn, h, precision="highest")         # (B, D)


if __name__ == "__main__":
    B, L, D = 16, 8, 32     # small shapes; tile heuristic picks tb=8 -> 2 grid steps
    key = jax.random.PRNGKey(0)
    kx, k1, kb1, k2, kb2 = jax.random.split(key, 5)

    x = jax.random.normal(kx, (B, L, D), dtype=jnp.float32)

    # Deterministic init mimicking nn.Linear default: U(-1/sqrt(fan_in), 1/sqrt(fan_in))
    bound = 1.0 / (D ** 0.5)
    w1 = jax.random.uniform(k1, (1, D), jnp.float32, -bound, bound)    # fc1.weight
    b1 = jax.random.uniform(kb1, (1,), jnp.float32, -bound, bound)     # fc1.bias
    w2 = jax.random.uniform(k2, (D, D), jnp.float32, -bound, bound)    # fc2.weight
    b2 = jax.random.uniform(kb2, (D,), jnp.float32, -bound, bound)     # fc2.bias

    out = atten_forward(x, w1, b1, w2, b2)
    out = jax.block_until_ready(out)

    ref = atten_reference(x, w1, b1, w2, b2)
    assert out.shape == (B, D)
    assert jnp.allclose(out, ref, atol=1e-5, rtol=1e-5), "mismatch vs reference"

    print("KERNEL_OK")
</pallas_src>

<mosaic_0001>
module attributes {stable_mosaic.version = 11 : i64} {
  func.func @atten_kernel(%arg0: i32, %arg1: memref<64x32xf32, #tpu.memory_space<vmem>>, %arg2: memref<32x128xf32, #tpu.memory_space<vmem>>, %arg3: memref<1x128xf32, #tpu.memory_space<vmem>>, %arg4: memref<8x128xf32, #tpu.memory_space<vmem>>) attributes {dimension_semantics = [#tpu.dimension_semantics<parallel>], iteration_bounds = array<i64: 2>, scalar_prefetch = 0 : i64, scratch_operands = 0 : i64, tpu.core_type = #tpu.core_type<tc>, window_params = [{transform_indices = @transform_0, window_bounds = array<i64: 64, 32>}, {pipeline_mode = #tpu.pipeline_mode<synchronous>, transform_indices = @transform_1, window_bounds = array<i64: 32, 128>}, {pipeline_mode = #tpu.pipeline_mode<synchronous>, transform_indices = @transform_2, window_bounds = array<i64: 1, 128>}, {transform_indices = @transform_3, window_bounds = array<i64: 8, 128>}]} {
    %c0 = arith.constant 0 : index
    %c0_0 = arith.constant 0 : index
    %0 = vector.load %arg1[%c0, %c0_0] : memref<64x32xf32, #tpu.memory_space<vmem>>, vector<64x32xf32>
    %c0_1 = arith.constant 0 : index
    %c0_2 = arith.constant 0 : index
    %1 = vector.load %arg2[%c0_1, %c0_2] : memref<32x128xf32, #tpu.memory_space<vmem>>, vector<32x128xf32>
    %cst = arith.constant dense<0.000000e+00> : vector<64x128xf32>
    %2 = tpu.matmul %0, %1, %cst {dimension_numbers = #tpu.dot_dimension_numbers<[1], [0], [0], [1], [0, 0, 1, 1], [], []>} : vector<64x32xf32>, vector<32x128xf32>, vector<64x128xf32> -> vector<64x128xf32>
    %c0_3 = arith.constant 0 : index
    %c0_4 = arith.constant 0 : index
    %3 = vector.load %arg3[%c0_3, %c0_4] : memref<1x128xf32, #tpu.memory_space<vmem>>, vector<1x128xf32>
    %4 = vector.broadcast %3 : vector<1x128xf32> to vector<64x128xf32>
    %5 = arith.addf %2, %4 : vector<64x128xf32>
    %6 = vector.shape_cast %5 : vector<64x128xf32> to vector<8x8x128xf32>
    %7 = vector.extract_strided_slice %6 {offsets = [0, 0, 32], sizes = [8, 8, 1], strides = [1, 1, 1]} : vector<8x8x128xf32> to vector<8x8x1xf32>
    %cst_5 = arith.constant dense<0xFF800000> : vector<8x1xf32>
    %8 = vector.multi_reduction <maximumf>, %7, %cst_5 [1] : vector<8x8x1xf32> to vector<8x1xf32>
    %9 = vector.shape_cast %8 : vector<8x1xf32> to vector<8x1x1xf32>
    %10 = vector.broadcast %9 : vector<8x1x1xf32> to vector<8x8x1xf32>
    %11 = arith.subf %7, %10 : vector<8x8x1xf32>
    %12 = math.exp %11 : vector<8x8x1xf32>
    %cst_6 = arith.constant dense<0.000000e+00> : vector<8x1xf32>
    %13 = vector.multi_reduction <add>, %12, %cst_6 [1] : vector<8x8x1xf32> to vector<8x1xf32>
    %14 = vector.shape_cast %13 : vector<8x1xf32> to vector<8x1x1xf32>
    %15 = vector.broadcast %14 : vector<8x1x1xf32> to vector<8x8x1xf32>
    %16 = arith.divf %12, %15 : vector<8x8x1xf32>
    %cst_7 = arith.constant 0.000000e+00 : f32
    %17 = vector.broadcast %cst_7 : f32 to vector<8x8x128xf32>
    %18 = arith.maximumf %6, %17 : vector<8x8x128xf32>
    %19 = vector.broadcast %16 : vector<8x8x1xf32> to vector<8x8x128xf32>
    %20 = arith.mulf %19, %18 : vector<8x8x128xf32>
    %cst_8 = arith.constant dense<0.000000e+00> : vector<8x128xf32>
    %21 = vector.multi_reduction <add>, %20, %cst_8 [1] : vector<8x8x128xf32> to vector<8x128xf32>
    %c0_9 = arith.constant 0 : index
    %c0_10 = arith.constant 0 : index
    %22 = vector.load %arg4[%c0_9, %c0_10] : memref<8x128xf32, #tpu.memory_space<vmem>>, vector<8x128xf32>
    tpu.vector_store %arg4[%c0_9, %c0_10], %21 {strides = array<i32>} : memref<8x128xf32, #tpu.memory_space<vmem>>, vector<8x128xf32>,
    return
  }
  func.func @transform_0(%arg0: i32) -> (i32, i32) {
    %c0_i32 = arith.constant 0 : i32
    %c0_i32_0 = arith.constant 0 : i32
    return %arg0, %c0_i32 : i32, i32
  }
  func.func @transform_1(%arg0: i32) -> (i32, i32) {
    %c0_i32 = arith.constant 0 : i32
    %c0_i32_0 = arith.constant 0 : i32
    %c0_i32_1 = arith.constant 0 : i32
    return %c0_i32, %c0_i32_0 : i32, i32
  }
  func.func @transform_2(%arg0: i32) -> (i32, i32) {
    %c0_i32 = arith.constant 0 : i32
    %c0_i32_0 = arith.constant 0 : i32
    %c0_i32_1 = arith.constant 0 : i32
    return %c0_i32, %c0_i32_0 : i32, i32
  }
  func.func @transform_3(%arg0: i32) -> (i32, i32) {
    %c0_i32 = arith.constant 0 : i32
    %c0_i32_0 = arith.constant 0 : i32
    return %arg0, %c0_i32 : i32, i32
  }
}

</mosaic_0001>

<bundles_post_ra>
// kernel: tpu_custom_call.1
= control target key start
LH: loop header
LB: loop body
LE: loop exit
PB: predicated region body
PF: predicated region fallthrough
CT: control target
= control target key end

     0   :  { %8 = vsyncpa [#allocation3], 0  ;;  %s1112_s0 = inlined_call_operand.vmem [shape: f32[128,32], index: 0, kind: input, shape index: {}]   ;;  %s1113_s1 = inlined_call_operand.vmem [shape: f32[32,128], index: 1, kind: input, shape index: {}]   ;;  %s1114_s2 = inlined_call_operand.vmem [shape: f32[1,128], index: 2, kind: input, shape index: {}]   ;;  %s1115_s3 = inlined_call_operand.hbm [shape: f32[16,128], index: 3, kind: output, shape index: {}]  }
   0x1   :  { %10 = vsyncpa [#allocation3 + $0x1], 0  ;;  %s898_s12 = smov 0   ;;  %s900_s13 = smov 0  }
   0x2   :  { %s902_s14 = smov 0   ;;  %s904_s15 = smov 0  }
   0x3 LB: > { %s919_s16 = sadd.s32 4294967295, %s874_s15   ;;  %s674_s17 = sadd.s32 4294967294, %s874_s15   ;;  %s874_s15 = sphi %s904_s15, %s1121_s15   ;;  %s870_s14 = sphi %s902_s14, %s1120_s14   ;;  %s866_s13 = sphi %s900_s13, %s1119_s13   ;;  %s862_s12 = sphi %s898_s12, %s1118_s12  }
   0x4   : > { %s923_s18 = sadd.s32 1, %s874_s15   ;;  %s91_s19 = sadd.s32 1, %s870_s14 }
   0x5   : > { %s88_s20 = ssub.s32 %s874_s15, %s923_s18  ;;  %p101_p0 = scmp.ne.s32.totalorder %s870_s14, %s866_s13 }
   0x6   : > { %p89_p1 = scmp.eq.s32.totalorder %s88_s20, 0  ;;  %p102_p2 = scmp.eq.s32.totalorder %s919_s16, 1 }
   0x7   : > { %p107_p3 = scmp.ne.s32.totalorder %s866_s13, %s862_s12  ;;  %p108_p4 = scmp.eq.s32.totalorder %s674_s17, 1 }
   0x8   : > { %s934_s21 = scalar_select %p89_p1, %s870_s14, %s91_s19  }
   0x9   : > { %p936_p5 = por %p102_p2, %p101_p0  ;;  %p940_p6 = por %p108_p4, %p107_p3 }
   0xa   : > { %p677_p7 = scmp.ge.s32.totalorder %s874_s15, 1  ;;  %p141_p8 = scmp.lt.s32.totalorder %s874_s15, 3 }
   0xc   : > { %p142_p9 = pnand %p677_p7, %p141_p8 }
   0xd   : > { %v179_v0 = vld [vmem:[%s1113_s1] sm:$0xff] (!%p142_p9)  ;;  %v180_v1 = vld [vmem:[%s1113_s1 + $0x8] sm:$0xff] (!%p142_p9)  ;;  %v181_v2 = vld [vmem:[%s1113_s1 + $0x10] sm:$0xff] (!%p142_p9)  ;;  %s679_s30 = sshll.u32 (!%p142_p9), %s919_s16, 3  ;;  %vm190_vm0 = vcmask (!%p142_p9), 261120   ;;  %v876_v14 = vmov (!%p142_p9), 32  }
   0xe   : > { %145 = sbr.rel (%p142_p9) target bundleno = 467 (0x1d3), region = 32  ;;  %v726_v3 = vpack.c.bf16 (!%p142_p9), %v180_v1, %v179_v0  ;;  %v182_v4 = vld [vmem:[%s1113_s1 + $0x18] sm:$0xff] (!%p142_p9)  ;;  %p166_p10 = scmp.lt.s32.totalorder (!%p142_p9), %s679_s30, 15  ;;  %778 = vset.pattern.permute.xlu0 (!%p142_p9), %v876_v14  ;;  %779 = vset.pattern.permute.xlu1 (!%p142_p9), %v876_v14  ;;  %v681_v15 = vld [vmem:[%s1114_s2] ss:$0 sm:$0xff] (!%p142_p9)  ;;  %vm320_vm1 = vcmask (!%p142_p9), 269568  }
   0xf   : > { %v730_v5 = vpack.c.bf16 (!%p142_p9), %v182_v4, %v181_v2  ;;  %vm585_vm2 = vcmask (!%p142_p9), 1041409   ;;  %s162_s17 = sand.u32 (!%p142_p9), 1, %s866_s13   ;;  %vm587_vm3 = vcmask (!%p142_p9), 1042434   ;;  %vm589_vm4 = vcmask (!%p142_p9), 1043459   ;;  %s691_s20 = sshll.u32 (!%p142_p9), %s919_s16, 7 }
  0x10   : > { %727 = vmatprep.subr.bf16.mxu0 (!%p142_p9), %v726_v3  ;;  %734 = vmatprep.subr.bf16.mxu1 (!%p142_p9), %v726_v3  ;;  %s678_s19 = sshll.u32 (!%p142_p9), %s162_s17, 3  ;;  %vm591_vm5 = vcmask (!%p142_p9), 1044484   ;;  %vm593_vm6 = vcmask (!%p142_p9), 1045509   ;;  %vm595_vm7 = vcmask (!%p142_p9), 1046534   ;;  %vm597_vm8 = vcmask (!%p142_p9), 1047559   ;;  %s1068_s28 = scalar_lea.hbm (!%p142_p9), %s1115_s3, %s691_s20 }
  0x11   : > { %729 = vmatpush3.bf16.msra.mxu0 (!%p142_p9), %v726_v3  ;;  %736 = vmatpush3.bf16.msra.mxu1 (!%p142_p9), %v726_v3  ;;  %s164_s24 = scalar_lea.vmem (!%p142_p9), [#allocation2], %s678_s19  ;;  %s602_s16 = scalar_lea.sflag (!%p142_p9), [#allocation3], %s162_s17 }
  0x12   : > { %731 = vmatprep.subr.bf16.mxu0 (!%p142_p9), %v730_v5  ;;  %735 = vmatprep.subr.bf16.mxu1 (!%p142_p9), %v730_v5  ;;  %s615_s25 = sshll.u32 (!%p142_p9), %s164_s24, 4  ;;  %s1070_s25 = int_to_ptr.vmem [resolvable:$true] %s615_s25 }
  0x13   : > { %s812_s29 = scalar_lea.vmem (!%p142_p9), %s1070_s25, 128 }
  0x14   : > { %p813_p11 = scmp.ne.s32.totalorder (!%p142_p9), %s1070_s25, %s812_s29 }
  0x15   : > { %s1123_s30 = smov (!%p166_p10, %s679_s30), 15  ;;  %733 = vmatpush3.bf16.msra.mxu0 %v730_v5  ;;  %737 = vmatpush3.bf16.msra.mxu1 %v730_v5 }
  0x16   : > { %s680_s6 = sshll.u32 %s1123_s30, 3  ;;  %p814_p12 = pnand %p813_p11, %p936_p5 }
  0x17   : > { %s169_s9 = scalar_lea.vmem %s1112_s0, %s680_s6  ;;  %s877_s30 = smov [#allocation2]  }
  0x18   : > { %v171_v6 = vld [vmem:[%s169_s9] sm:$0xff]  ;;  %v172_v8 = vld [vmem:[%s169_s9 + $0x8] sm:$0xff]  ;;  %v173_v10 = vld [vmem:[%s169_s9 + $0x10] sm:$0xff]  ;;  %p815_p13 = pneg %p814_p12  ;;  %s816_s4 = sshll.u32 %s877_s30, 4  ;;  %s817_s4 = int_to_ptr.vmem [resolvable:$false] %s816_s4 }
  0x19   : > { %v175_v7 = vld [vmem:[%s169_s9 + $0x20] sm:$0xff]  ;;  %v176_v9 = vld [vmem:[%s169_s9 + $0x28] sm:$0xff]  ;;  %714 = vmatprep.mubr.msk.f32.mxu0 %vm190_vm0, %v171_v6  ;;  %v177_v11 = vld [vmem:[%s169_s9 + $0x30] sm:$0xff]  ;;  %s818_s5 = scalar_lea.vmem %s817_s4, 256  ;;  %p819_p0 = scmp.lt.s32.totalorder %s1070_s25, %s817_s4 }
  0x1a   : > { %720 = vmatprep.mubr.msk.f32.mxu1 %vm190_vm0, %v175_v7  ;;  %715 = vmatmul.mubr.msk.f32.vlgmr.msra.gmra.mrb[0].mxu0 %vm190_vm0, %v172_v8  ;;  %v174_v12 = vld [vmem:[%s169_s9 + $0x18] sm:$0xff]  ;;  %p820_p1 = scmp.lt.s32.totalorder %s818_s5, %s812_s29 }
  0x1b   : > { %721 = vmatmul.mubr.msk.f32.vlgmr.msra.gmra.mrb[0].mxu1 %vm190_vm0, %v176_v9  ;;  %717 = vmatprep.mubr.msk.f32.mxu0 %vm190_vm0, %v173_v10  ;;  %v178_v13 = vld [vmem:[%s169_s9 + $0x38] sm:$0xff] }
  0x1c   : > { %723 = vmatprep.mubr.msk.f32.mxu1 %vm190_vm0, %v177_v11  ;;  %p821_p2 = por %p820_p1, %p819_p0 }
  0x1e   : > { %718 = vmatmul.mubr.msk.f32.gmra.mrb[2].mxu0 %vm190_vm0, %v174_v12  ;;  %p822_p3 = pnand %p821_p2, %p815_p13 }
  0x1f   : > { %724 = vmatmul.mubr.msk.f32.gmra.mrb[2].mxu1 %vm190_vm0, %v178_v13 }
  0xed   : > { %v716_v16 = vpop.f32.mrb[0].mxu0 }
  0xee   : > { %v722_v17 = vpop.f32.mrb[0].mxu1  ;;  %v973_v18 = vadd.f32 %v716_v16, %v681_v15  ;;  %v281_v20 = vpop.f32.mrb[1].mxu0 }
  0xef   : > { %v975_v19 = vadd.f32 %v722_v17, %v681_v15  ;;  %v301_v21 = vpop.f32.mrb[1].mxu1  ;;  %v977_v22 = vadd.f32 %v681_v15, %v281_v20 }
  0xf0   : > { %v979_v23 = vadd.f32 %v681_v15, %v301_v21  ;;  %v328_v24 = vsel %vm320_vm1, %v973_v18, -inf }
  0xf1   : > { %v356_v25 = vsel %vm320_vm1, %v975_v19, -inf  ;;  %v329_v26 = vrot.slane %v328_v24, 4  ;;  %v321_v28 = vsel %vm320_vm1, %v977_v22, -inf  ;;  %v719_v30 = vpop.f32.mrb[2].mxu0 }
  0xf2   : > { %v357_v27 = vrot.slane %v356_v25, 4  ;;  %v349_v29 = vsel %vm320_vm1, %v979_v23, -inf  ;;  %v725_v31 = vpop.f32.mrb[2].mxu1  ;;  %v322_v32 = vrot.slane %v321_v28, 4  ;;  %v989_v34 = vadd.f32 %v719_v30, %v681_v15  ;;  %v291_v36 = vpop.f32.mrb[3].mxu0 }
  0xf3   : > { %v350_v33 = vrot.slane %v349_v29, 4  ;;  %v991_v35 = vadd.f32 %v725_v31, %v681_v15  ;;  %v311_v37 = vpop.f32.mrb[3].mxu1  ;;  %v330_v38 = vmax.f32 %v328_v24, %v329_v26  ;;  %v993_v40 = vadd.f32 %v681_v15, %v291_v36 }
  0xf4   : > { %v358_v39 = vmax.f32 %v356_v25, %v357_v27  ;;  %v995_v41 = vadd.f32 %v681_v15, %v311_v37  ;;  %v323_v42 = vmax.f32 %v321_v28, %v322_v32  ;;  %v342_v44 = vsel %vm320_vm1, %v989_v34, -inf }
  0xf5   : > { %v351_v43 = vmax.f32 %v349_v29, %v350_v33  ;;  %v370_v45 = vsel %vm320_vm1, %v991_v35, -inf  ;;  %v331_v46 = vrot.slane %v330_v38, 2  ;;  %v343_v48 = vrot.slane %v342_v44, 4 }
  0xf6   : > { %v359_v47 = vrot.slane %v358_v39, 2  ;;  %v371_v49 = vrot.slane %v370_v45, 4  ;;  %v324_v50 = vrot.slane %v323_v42, 2  ;;  %v335_v52 = vsel %vm320_vm1, %v993_v40, -inf }
  0xf7   : > { %v352_v51 = vrot.slane %v351_v43, 2  ;;  %v363_v53 = vsel %vm320_vm1, %v995_v41, -inf  ;;  %v332_v54 = vmax.f32 %v330_v38, %v331_v46  ;;  %v344_v56 = vmax.f32 %v342_v44, %v343_v48 }
  0xf8   : > { %v360_v55 = vmax.f32 %v358_v39, %v359_v47  ;;  %v372_v57 = vmax.f32 %v370_v45, %v371_v49  ;;  %v325_v58 = vmax.f32 %v323_v42, %v324_v50  ;;  %v336_v60 = vrot.slane %v335_v52, 4 }
  0xf9   : > { %v353_v59 = vmax.f32 %v351_v43, %v352_v51  ;;  %v364_v61 = vrot.slane %v363_v53, 4  ;;  %v333_v62 = vrot.slane %v332_v54, 1  ;;  %v345_v0 = vrot.slane %v344_v56, 2 }
  0xfa   : > { %v361_v63 = vrot.slane %v360_v55, 1  ;;  %v373_v1 = vrot.slane %v372_v57, 2  ;;  %v326_v2 = vrot.slane %v325_v58, 1  ;;  %v337_v4 = vmax.f32 %v335_v52, %v336_v60 }
  0xfb   : > { %v354_v3 = vrot.slane %v353_v59, 1  ;;  %v365_v5 = vmax.f32 %v363_v53, %v364_v61  ;;  %v334_v6 = vmax.f32 %v332_v54, %v333_v62  ;;  %v346_v8 = vmax.f32 %v344_v56, %v345_v0 }
  0xfc   : > { %v362_v7 = vmax.f32 %v360_v55, %v361_v63  ;;  %v374_v9 = vmax.f32 %v372_v57, %v373_v1  ;;  %v327_v10 = vmax.f32 %v325_v58, %v326_v2  ;;  %v338_v12 = vrot.slane %v337_v4, 2 }
  0xfd   : > { %v355_v11 = vmax.f32 %v353_v59, %v354_v3  ;;  %v366_v13 = vrot.slane %v365_v5, 2  ;;  %v378_v14 = vsub.f32 %v973_v18, %v334_v6  ;;  %v347_v16 = vrot.slane %v346_v8, 1 }
  0xfe   : > { %v382_v15 = vsub.f32 %v975_v19, %v362_v7  ;;  %v375_v17 = vrot.slane %v374_v9, 1  ;;  %v377_v20 = vsub.f32 %v977_v22, %v327_v10  ;;  %v339_v24 = vmax.f32 %v337_v4, %v338_v12 }
  0xff   : > { %v381_v21 = vsub.f32 %v979_v23, %v355_v11  ;;  %v367_v25 = vmax.f32 %v365_v5, %v366_v13  ;;  %v387_v26 = vmul.f32 1.442695, %v378_v14  ;;  %v348_v28 = vmax.f32 %v346_v8, %v347_v16 }
 0x100   : > { %v395_v27 = vmul.f32 1.442695, %v382_v15  ;;  %v376_v29 = vmax.f32 %v374_v9, %v375_v17  ;;  %v385_v30 = vmul.f32 1.442695, %v377_v20  ;;  %v340_v32 = vrot.slane %v339_v24, 1 }
 0x101   : > { %v393_v31 = vmul.f32 1.442695, %v381_v21  ;;  %v368_v33 = vrot.slane %v367_v25, 1  ;;  %780 = vpow2.f32 %v387_v26  ;;  %v380_v36 = vsub.f32 %v989_v34, %v348_v28 }
 0x102   : > { %v384_v37 = vsub.f32 %v991_v35, %v376_v29  ;;  %782 = vpow2.f32 %v395_v27  ;;  %v341_v38 = vmax.f32 %v339_v24, %v340_v32 }
 0x103   : > { %v369_v39 = vmax.f32 %v367_v25, %v368_v33  ;;  %784 = vpow2.f32 %v385_v30  ;;  %v391_v42 = vmul.f32 1.442695, %v380_v36 }
 0x104   : > { %v399_v43 = vmul.f32 1.442695, %v384_v37  ;;  %786 = vpow2.f32 %v393_v31  ;;  %v379_v44 = vsub.f32 %v993_v40, %v341_v38 }
 0x105   : > { %v383_v45 = vsub.f32 %v995_v41, %v369_v39  ;;  %788 = vpow2.f32 %v391_v42 }
 0x106   : > { %790 = vpow2.f32 %v399_v43  ;;  %v389_v46 = vmul.f32 1.442695, %v379_v44 }
 0x107   : > { %v397_v47 = vmul.f32 1.442695, %v383_v45 }
 0x108   : > { %792 = vpow2.f32 %v389_v46 }
 0x109   : > { %794 = vpow2.f32 %v397_v47 }
 0x10b   : > { %v1013_v48 = vpop.eup %780 }
 0x10c   : > { %v1015_v49 = vpop.eup %782  ;;  %v408_v50 = vsel %vm320_vm1, %v1013_v48, 0.0 }
 0x10d   : > { %v1019_v51 = vpop.eup %784  ;;  %v409_v52 = vrot.slane %v408_v50, 4  ;;  %v436_v53 = vsel %vm320_vm1, %v1015_v49, 0.0 }
 0x10e   : > { %v1023_v54 = vpop.eup %786  ;;  %v437_v55 = vrot.slane %v436_v53, 4  ;;  %v401_v56 = vsel %vm320_vm1, %v1019_v51, 0.0 }
 0x10f   : > { %v1027_v57 = vpop.eup %788  ;;  %v402_v58 = vrot.slane %v401_v56, 4  ;;  %v429_v59 = vsel %vm320_vm1, %v1023_v54, 0.0  ;;  %v410_v60 = vadd.f32 %v409_v52, %v408_v50 }
 0x110   : > { %v1031_v61 = vpop.eup %790  ;;  %v438_v62 = vadd.f32 %v437_v55, %v436_v53  ;;  %v430_v63 = vrot.slane %v429_v59, 4  ;;  %v422_v0 = vsel %vm320_vm1, %v1027_v57, 0.0 }
 0x111   : > { %v403_v1 = vadd.f32 %v402_v58, %v401_v56  ;;  %v423_v2 = vrot.slane %v422_v0, 4  ;;  %v450_v3 = vsel %vm320_vm1, %v1031_v61, 0.0  ;;  %v411_v4 = vrot.slane %v410_v60, 2 }
 0x112   : > { %v1037_v5 = vpop.eup %792  ;;  %v431_v6 = vadd.f32 %v430_v63, %v429_v59  ;;  %v451_v7 = vrot.slane %v450_v3, 4  ;;  %v439_v8 = vrot.slane %v438_v62, 2 }
 0x113   : > { %v1039_v9 = vpop.eup %794  ;;  %v415_v10 = vsel %vm320_vm1, %v1037_v5, 0.0  ;;  %v412_v11 = vadd.f32 %v411_v4, %v410_v60  ;;  %v424_v12 = vadd.f32 %v423_v2, %v422_v0  ;;  %v404_v13 = vrot.slane %v403_v1, 2 }
 0x114   : > { %v452_v14 = vadd.f32 %v451_v7, %v450_v3  ;;  %v416_v15 = vrot.slane %v415_v10, 4  ;;  %v443_v16 = vsel %vm320_vm1, %v1039_v9, 0.0  ;;  %v432_v17 = vrot.slane %v431_v6, 2 }
 0x115   : > { %v444_v20 = vrot.slane %v443_v16, 4  ;;  %v413_v21 = vrot.slane %v412_v11, 1  ;;  %v425_v24 = vrot.slane %v424_v12, 2  ;;  %v405_v25 = vadd.f32 %v404_v13, %v403_v1 }
 0x116   : > { %v417_v26 = vadd.f32 %v416_v15, %v415_v10  ;;  %v433_v27 = vadd.f32 %v432_v17, %v431_v6  ;;  %v440_v28 = vadd.f32 %v439_v8, %v438_v62  ;;  %v453_v29 = vrot.slane %v452_v14, 2 }
 0x117   : > { %v445_v30 = vadd.f32 %v444_v20, %v443_v16  ;;  %v414_v31 = vadd.f32 %v413_v21, %v412_v11  ;;  %v426_v32 = vadd.f32 %v425_v24, %v424_v12  ;;  %v406_v33 = vrot.slane %v405_v25, 1 }
 0x118   : > { %v418_v36 = vrot.slane %v417_v26, 2  ;;  %v434_v37 = vrot.slane %v433_v27, 1  ;;  %v441_v44 = vrot.slane %v440_v28, 1  ;;  %v454_v45 = vadd.f32 %v453_v29, %v452_v14 }
 0x119   : > { %796 = vrcp.f32 %v414_v31  ;;  %v427_v38 = vrot.slane %v426_v32, 1  ;;  %v407_v39 = vadd.f32 %v406_v33, %v405_v25  ;;  %v446_v42 = vrot.slane %v445_v30, 2 }
 0x11a   : > { %v419_v43 = vadd.f32 %v418_v36, %v417_v26  ;;  %v435_v47 = vadd.f32 %v434_v37, %v433_v27  ;;  %v442_v56 = vadd.f32 %v441_v44, %v440_v28  ;;  %v455_v59 = vrot.slane %v454_v45, 1 }
 0x11b   : > { %v428_v46 = vadd.f32 %v427_v38, %v426_v32  ;;  %798 = vrcp.f32 %v407_v39  ;;  %v447_v50 = vadd.f32 %v446_v42, %v445_v30  ;;  %v473_v16 = vmax.f32 %v977_v22, 0.0 }
 0x11c   : > { %v420_v52 = vrot.slane %v419_v43, 1  ;;  %v456_v62 = vadd.f32 %v455_v59, %v454_v45  ;;  %v478_v38 = vmax.f32 %v975_v19, 0.0  ;;  %v479_v42 = vmax.f32 %v995_v41, 0.0 }
 0x11d   : > { %800 = vrcp.f32 %v428_v46  ;;  %v448_v53 = vrot.slane %v447_v50, 1 }
 0x11e   : > { %v421_v55 = vadd.f32 %v420_v52, %v419_v43  ;;  %802 = vrcp.f32 %v435_v47 }
 0x11f   : > { %v449_v58 = vadd.f32 %v448_v53, %v447_v50 }
 0x120   : > { %804 = vrcp.f32 %v421_v55  ;;  %v480_v55 = vmax.f32 %v991_v35, 0.0 }
 0x121   : > { %806 = vrcp.f32 %v442_v56 }
 0x122   : > { %808 = vrcp.f32 %v449_v58 }
 0x123   : > { %v797_v60 = vpop.eup %796  ;;  %810 = vrcp.f32 %v456_v62 }
 0x124   : > { %v460_v63 = vmul.f32 %v797_v60, %v1013_v48 }
 0x125   : > { %v799_v0 = vpop.eup %798 }
 0x126   : > { %488 = vperm.xlu0 %778, %v460_v63   ;;  %v458_v3 = vmul.f32 %v799_v0, %v1019_v51 }
 0x127   : > { %v801_v1 = vpop.eup %800 }
 0x128   : > { %v464_v2 = vmul.f32 %v801_v1, %v1027_v57  ;;  %v803_v4 = vpop.eup %802  ;;  %v474_v57 = vmax.f32 %v973_v18, 0.0  ;;  %v477_v18 = vmax.f32 %v979_v23, 0.0 }
 0x129   : > { %v466_v10 = vmul.f32 %v803_v4, %v1023_v54  ;;  %v476_v54 = vmax.f32 %v989_v34, 0.0 }
 0x12a   : > { %v805_v6 = vpop.eup %804  ;;  %498 = vperm.xlu1 %779, %v464_v2   ;;  %483 = vperm.xlu0 %778, %v458_v3  }
 0x12b   : > { %v807_v7 = vpop.eup %806  ;;  %v462_v8 = vmul.f32 %v805_v6, %v1037_v5 }
 0x12c   : > { %v809_v11 = vpop.eup %808  ;;  %v468_v48 = vmul.f32 %v807_v7, %v1015_v49 }
 0x12d   : > { %v470_v12 = vmul.f32 %v809_v11, %v1039_v9  ;;  %v811_v13 = vpop.eup %810 }
 0x12e   : > { %493 = vperm.xlu1 %779, %v462_v8   ;;  %503 = vperm.xlu0 %778, %v466_v10   ;;  %v472_v51 = vmul.f32 %v811_v13, %v1031_v61  ;;  %v475_v61 = vmax.f32 %v993_v40, 0.0 }
 0x132   : > { %508 = vperm.xlu1 %779, %v468_v48   ;;  %513 = vperm.xlu0 %778, %v470_v12  }
 0x136   : > { %518 = vperm.xlu1 %779, %v472_v51  }
 0x1a5   : > { %v489_v14 = vpop.permute.xlu0 %488 }
 0x1a6   : > { %v522_v15 = vmul.f32 %v489_v14, %v474_v57 }
 0x1a8   : > { %v535_v5 = vrot.slane %v522_v15, 4 }
 0x1a9   : > { %v499_v17 = vpop.permute.xlu1 %498  ;;  %v484_v20 = vpop.permute.xlu0 %483 }
 0x1aa   : > { %v536_v49 = vadd.f32 %v535_v5, %v522_v15  ;;  %v524_v21 = vmul.f32 %v499_v17, %v476_v54  ;;  %v521_v9 = vmul.f32 %v484_v20, %v473_v16 }
 0x1ac   : > { %v537_v24 = vrot.slane %v536_v49, 2  ;;  %v547_v25 = vrot.slane %v524_v21, 4  ;;  %v529_v26 = vrot.slane %v521_v9, 4 }
 0x1ad   : > { %v494_v27 = vpop.permute.xlu1 %493  ;;  %v504_v28 = vpop.permute.xlu0 %503 }
 0x1ae   : > { %v538_v29 = vadd.f32 %v537_v24, %v536_v49  ;;  %v548_v30 = vadd.f32 %v547_v25, %v524_v21  ;;  %v530_v31 = vadd.f32 %v529_v26, %v521_v9  ;;  %v523_v34 = vmul.f32 %v494_v27, %v475_v61 }
 0x1af   : > { %v525_v32 = vmul.f32 %v504_v28, %v477_v18 }
 0x1b0   : > { %v549_v22 = vrot.slane %v548_v30, 2  ;;  %v531_v33 = vrot.slane %v530_v31, 2  ;;  %v541_v36 = vrot.slane %v523_v34, 4  ;;  %v539_v40 = vrot.slane %v538_v29, 1 }
 0x1b1   : > { %v553_v37 = vrot.slane %v525_v32, 4  ;;  %v509_v39 = vpop.permute.xlu1 %508  ;;  %v514_v43 = vpop.permute.xlu0 %513 }
 0x1b2   : > { %v532_v44 = vadd.f32 %v531_v33, %v530_v31  ;;  %v542_v45 = vadd.f32 %v541_v36, %v523_v34  ;;  %v550_v23 = vadd.f32 %v549_v22, %v548_v30  ;;  %v526_v47 = vmul.f32 %v509_v39, %v478_v38 }
 0x1b3   : > { %v554_v46 = vadd.f32 %v553_v37, %v525_v32  ;;  %v527_v50 = vmul.f32 %v514_v43, %v479_v42  ;;  %v540_v60 = vadd.f32 %v539_v40, %v538_v29 }
 0x1b4   : > { %v533_v52 = vrot.slane %v532_v44, 1  ;;  %v543_v53 = vrot.slane %v542_v45, 2  ;;  %v559_v58 = vrot.slane %v526_v47, 4  ;;  %v551_v0 = vrot.slane %v550_v23, 1 }
 0x1b5   : > { %v555_v56 = vrot.slane %v554_v46, 2  ;;  %v565_v19 = vrot.slane %v527_v50, 4  ;;  %v519_v59 = vpop.permute.xlu1 %518 }
 0x1b6   : > { %v534_v41 = vadd.f32 %v533_v52, %v532_v44  ;;  %v544_v62 = vadd.f32 %v543_v53, %v542_v45  ;;  %v528_v63 = vmul.f32 %v519_v59, %v480_v55  ;;  %v560_v2 = vadd.f32 %v559_v58, %v526_v47 }
 0x1b7   : > { %v556_v1 = vadd.f32 %v555_v56, %v554_v46  ;;  %v566_v3 = vadd.f32 %v565_v19, %v527_v50  ;;  %v552_v12 = vadd.f32 %v551_v0, %v550_v23 }
 0x1b8   : > { %v586_v4 = vsel %vm585_vm2, %v540_v60, %v534_v41  ;;  %v545_v6 = vrot.slane %v544_v62, 1  ;;  %v571_v7 = vrot.slane %v528_v63, 4  ;;  %v561_v8 = vrot.slane %v560_v2, 2 }
 0x1b9   : > { %v557_v35 = vrot.slane %v556_v1, 1  ;;  %v567_v10 = vrot.slane %v566_v3, 2 }
 0x1ba   : > { %v546_v11 = vadd.f32 %v545_v6, %v544_v62  ;;  %v572_v48 = vadd.f32 %v571_v7, %v528_v63  ;;  %v562_v13 = vadd.f32 %v561_v8, %v560_v2 }
 0x1bb   : > { %v568_v51 = vadd.f32 %v567_v10, %v566_v3  ;;  %v558_v14 = vadd.f32 %v557_v35, %v556_v1 }
 0x1bc   : > { %v588_v57 = vsel %vm587_vm3, %v546_v11, %v586_v4  ;;  %v573_v15 = vrot.slane %v572_v48, 2  ;;  %v563_v54 = vrot.slane %v562_v13, 1 }
 0x1bd   : > { %v590_v5 = vsel %vm589_vm4, %v552_v12, %v588_v57  ;;  %v569_v16 = vrot.slane %v568_v51, 1 }
 0x1be   : > { %v592_v17 = vsel %vm591_vm5, %v558_v14, %v590_v5  ;;  %v574_v20 = vadd.f32 %v573_v15, %v572_v48  ;;  %v564_v49 = vadd.f32 %v563_v54, %v562_v13 }
 0x1bf   : > { %v570_v21 = vadd.f32 %v569_v16, %v568_v51 }
 0x1c0   : > { %v575_v9 = vrot.slane %v574_v20, 1  ;;  %v594_v24 = vsel %vm593_vm6, %v564_v49, %v592_v17 }
 0x1c1   : > { %v596_v26 = vsel %vm595_vm7, %v570_v21, %v594_v24 }
 0x1c2   : > { %v576_v25 = vadd.f32 %v575_v9, %v574_v20 }
 0x1c4   : > { %v598_v61 = vsel %vm597_vm8, %v576_v25, %v596_v26 }
 0x1c5   : > { %600 = vst [vmem:[%s164_s24] sm:$0xff] %v598_v61 }
 0x1c6   : > { %825 = shalt.err (!%p822_p3)
}
 0x1c7   : > { %s826_s6 = scalar_lea.hbm %s1068_s28, 128  ;;  %s830_s9 = scalar_lea.hbm %s1115_s3, 256 }
 0x1c8   : > { %p827_p4 = scmp.ne.s32.totalorder %s1068_s28, %s826_s6  ;;  %p831_p9 = scmp.lt.u32.totalorder %s1068_s28, %s1115_s3 }
 0x1c9   : > { %p832_p10 = scmp.lt.u32.totalorder %s830_s9, %s826_s6  ;;  %p834_p12 = scmp.lt.u32.totalorder %s826_s6, %s1068_s28 }
 0x1ca   : > { %p828_p7 = pnand %p827_p4, %p936_p5 }
 0x1cb   : > { %p833_p11 = por %p832_p10, %p831_p9 }
 0x1cc   : > { %p829_p8 = pneg %p828_p7 }
 0x1cd   : > { %p835_p13 = por %p834_p12, %p833_p11 }
 0x1cf   : > { %p836_p0 = pnand %p835_p13, %p829_p8 }
 0x1d1   : > { %839 = shalt.err (!%p836_p0)
}
 0x1d2   : > { %738 = dma.vmem_to_hbm [thread:$0]  (%p936_p5), %s1070_s25, 128, %s1068_s28, %s602_s16  }
 0x1d3 PF: > { %p744_p1 = scmp.ge.s32.totalorder %s874_s15, 2  ;;  %s627_s17 = sand.u32 1, %s862_s12  }
 0x1d4   : > { %s628_s19 = scalar_lea.sflag [#allocation3], %s627_s17 }
 0x1d5   : > { %p741_p2 = pnand %p744_p1, %p940_p6 }
 0x1d7   : > { %857 = dma.done.wait (!%p741_p2), %s628_s19, 128  }
 0x1d8   : > { %859 = vsyncadd (!%p741_p2), %s628_s19, 4294967168  ;;  %p13_p3 = scmp.ge.s32.totalorder %s923_s18, 4   ;;  %s1118_s12 = smov %s866_s13 }
 0x1d9   : > { %s1119_s13 = smov %s870_s14  ;;  %s1120_s14 = smov %s934_s21 }
 0x1da   : > { %s1121_s15 = smov %s923_s18  ;;  %15 = sbr.rel (!%p13_p3) target bundleno = 3 (0x3), region = 67 }
 0x1e1   :  { %633 = vsyncpa [#allocation3], 1 }
 0x1e2   :  { %635 = vsyncpa [#allocation3 + $0x1], 1 }

</bundles_post_ra>
